<compile_context>
chip_gen: v7x
topology: tpu7x:2x2x1
jax: 0.10.0
libtpu: 0.0.40
codegen_flags: <defaults>
</compile_context>

<pallas_src>
import functools
import math

import jax
import jax.numpy as jnp
from jax.experimental import pallas as pl
from jax.experimental.pallas import tpu as pltpu


def _round_up(v, m):
    return (v + m - 1) // m * m


def gcn_kernel(adj_ref, xs_ref, dinv_ref, acm_ref, w1_ref, b1_ref, w2_ref, b2_ref,
               out_ref, acc_ref, s_ref, *, nclass):
    i = pl.program_id(0)          # row tile of A (destination nodes)
    k = pl.program_id(1)          # column tile of A (source nodes) == reduction axis
    ni = pl.num_programs(0)
    nk = pl.num_programs(1)

    @pl.when(k == 0)
    def _():
        acc_ref[...] = jnp.zeros_like(acc_ref)

    # (D^-1/2 X) W1 for this source tile (bf16 MXU, f32 accumulate), then the
    # (A + I) tile matmul accumulated in f32.
    xw1 = jnp.dot(xs_ref[...], w1_ref[...], preferred_element_type=jnp.float32)
    acc_ref[...] += jnp.dot(adj_ref[...], xw1.astype(jnp.bfloat16),
                            preferred_element_type=jnp.float32)

    @pl.when(k == nk - 1)
    def _():
        # Finish GCNConv-1 for this row tile: destination-side D^-1/2, bias, ReLU.
        h1 = jnp.maximum(dinv_ref[...] * acc_ref[...] + b1_ref[...], 0.0)   # [tm, nhid_p]

        @pl.when(i == 0)
        def _():
            s_ref[...] = jnp.zeros_like(s_ref)

        # Pooled-sum shortcut: accumulate colmean(A_norm)[rows] . h1[rows].
        s_ref[...] += jnp.sum(acm_ref[...] * h1, axis=0, keepdims=True)      # [1, nhid_p]

        @pl.when(i == ni - 1)
        def _():
            pooled = jnp.dot(s_ref[...], w2_ref[...],
                             preferred_element_type=jnp.float32) + b2_ref[...]  # [1, nclass_p]
            pooled = jnp.maximum(pooled, 0.0)          # relu(global_mean_pool(h2))
            # TODO(synk): F.dropout(training=self.training) is stochastic in train mode;
            # implemented here as inference-mode identity.
            lane = jax.lax.broadcasted_iota(jnp.int32, pooled.shape, 1)
            valid = lane < nclass
            z = jnp.where(valid, pooled, -jnp.inf)     # mask padded class lanes
            m = jnp.max(z, axis=-1, keepdims=True)
            e = jnp.exp(z - m)
            lse = jnp.log(jnp.sum(e, axis=-1, keepdims=True))
            out_ref[...] = jnp.where(valid, z - m - lse, 0.0)


def gcn_base_forward(x, edge_index, w1, b1, w2, b2):
    """x: [N, nfeat] float32, edge_index: [2, E] int32 (row 0 = src, row 1 = dst)."""
    edge_index = edge_index.reshape(2, -1)
    n, nfeat = x.shape
    nhid = w1.shape[1]
    nclass = w2.shape[1]

    # ---- glue: dense (A + I) via scatter-add (counts duplicate edges like PyG) -----
    src, dst = edge_index[0], edge_index[1]
    adj = jnp.zeros((n, n), jnp.float32).at[dst, src].add(1.0)   # message src -> dst
    adj = adj + jnp.eye(n, dtype=jnp.float32)                    # add_self_loops
    deg = jnp.sum(adj, axis=1)
    dinv = jnp.where(deg > 0, jax.lax.rsqrt(deg), 0.0)           # D^-1/2
    # Column-mean of A_norm = D^-1/2 (A+I) D^-1/2 : exact pooled-sum weights.
    acm = dinv * (adj.T @ dinv) / n                              # [n]

    # ---- padding / tiling -----------------------------------------------------------
    nfeat_p = _round_up(nfeat, 128)
    nhid_p = _round_up(nhid, 128)
    nclass_p = _round_up(nclass, 128)
    if n <= 512:
        n_p = _round_up(n, 128)
        tm = tk = n_p                       # single tile for small graphs
    else:
        tm, tk = 256, 512                   # row tile x reduction tile
        n_p = _round_up(n, math.lcm(tm, tk))

    adj_p = jnp.zeros((n_p, n_p), jnp.bfloat16).at[:n, :n].set(adj.astype(jnp.bfloat16))
    # Fold source-side D^-1/2 into X (exact algebra), bf16 for the MXU.
    xs = (x * dinv[:, None]).astype(jnp.bfloat16)
    xs_p = jnp.zeros((n_p, nfeat_p), jnp.bfloat16).at[:n, :nfeat].set(xs)
    dinv_p = jnp.zeros((n_p, 1), jnp.float32).at[:n, 0].set(dinv)
    acm_p = jnp.zeros((n_p, 1), jnp.float32).at[:n, 0].set(acm)
    w1_p = jnp.zeros((nfeat_p, nhid_p), jnp.bfloat16).at[:nfeat, :nhid].set(
        w1.astype(jnp.bfloat16))
    b1_p = jnp.zeros((1, nhid_p), jnp.float32).at[0, :nhid].set(b1.reshape(-1))
    w2_p = jnp.zeros((nhid_p, nclass_p), jnp.float32).at[:nhid, :nclass].set(w2)
    b2_p = jnp.zeros((1, nclass_p), jnp.float32).at[0, :nclass].set(b2.reshape(-1))

    grid = (n_p // tm, n_p // tk)

    out = pl.pallas_call(
        functools.partial(gcn_kernel, nclass=nclass),
        out_shape=jax.ShapeDtypeStruct((1, nclass_p), jnp.float32),
        grid_spec=pltpu.PrefetchScalarGridSpec(
            num_scalar_prefetch=0,
            grid=grid,
            in_specs=[
                pl.BlockSpec((tm, tk), lambda i, k: (i, k)),            # (A+I) tile (bf16)
                pl.BlockSpec((tk, nfeat_p), lambda i, k: (k, 0)),       # D^-1/2 X tile (bf16)
                pl.BlockSpec((tm, 1), lambda i, k: (i, 0)),             # D^-1/2 (dest rows)
                pl.BlockSpec((tm, 1), lambda i, k: (i, 0)),             # colmean(A_norm) rows
                pl.BlockSpec((nfeat_p, nhid_p), lambda i, k: (0, 0)),   # W1
                pl.BlockSpec((1, nhid_p), lambda i, k: (0, 0)),         # b1
                pl.BlockSpec((nhid_p, nclass_p), lambda i, k: (0, 0)),  # W2
                pl.BlockSpec((1, nclass_p), lambda i, k: (0, 0)),       # b2
            ],
            out_specs=pl.BlockSpec((1, nclass_p), lambda i, k: (0, 0)),
            scratch_shapes=[
                pltpu.VMEM((tm, nhid_p), jnp.float32),   # GCNConv-1 accumulator (per row tile)
                pltpu.VMEM((1, nhid_p), jnp.float32),    # pooled-sum accumulator (whole grid)
            ],
        ),
        # Both axes 'arbitrary': the pooled-sum scratch is a reduction across row tiles,
        # so the row axis cannot be megacore-parallel without a cross-core combine.
        compiler_params=pltpu.CompilerParams(
            dimension_semantics=("arbitrary", "arbitrary")),
    )(adj_p, xs_p, dinv_p, acm_p, w1_p, b1_p, w2_p, b2_p)

    return out[:, :nclass]


if __name__ == "__main__":
    # Small shapes consistent with the module's forward.
    N, NFEAT, NHID, NCLASS = 16, 8, 32, 8

    key = jax.random.PRNGKey(0)
    kx, kw1, kw2 = jax.random.split(key, 3)

    x = jax.random.normal(kx, (N, NFEAT), dtype=jnp.float32)

    # Deterministic graph: bidirectional ring over N nodes -> edge_index [2, 2N]
    idx = jnp.arange(N, dtype=jnp.int32)
    src = jnp.concatenate([idx, (idx + 1) % N])
    dst = jnp.concatenate([(idx + 1) % N, idx])
    edge_index = jnp.stack([src, dst], axis=0)

    # GCNConv params: glorot-style weights, zero biases (deterministic).
    lim1 = (6.0 / (NFEAT + NHID)) ** 0.5
    lim2 = (6.0 / (NHID + NCLASS)) ** 0.5
    w1 = jax.random.uniform(kw1, (NFEAT, NHID), jnp.float32, -lim1, lim1)
    b1 = jnp.zeros((1, NHID), dtype=jnp.float32)
    w2 = jax.random.uniform(kw2, (NHID, NCLASS), jnp.float32, -lim2, lim2)
    b2 = jnp.zeros((1, NCLASS), dtype=jnp.float32)

    out = gcn_base_forward(x, edge_index, w1, b1, w2, b2)
    out = jax.block_until_ready(out)

    assert out.shape == (1, NCLASS)
    # log_softmax sanity: probabilities sum to 1.
    assert jnp.allclose(jnp.sum(jnp.exp(out)), 1.0, atol=1e-4)
    print("KERNEL_OK")
</pallas_src>

<mosaic_0001>
module attributes {stable_mosaic.version = 11 : i64} {
  func.func @gcn_kernel(%arg0: i32, %arg1: i32, %arg2: memref<128x128xbf16, #tpu.memory_space<vmem>>, %arg3: memref<128x128xbf16, #tpu.memory_space<vmem>>, %arg4: memref<128x1xf32, #tpu.memory_space<vmem>>, %arg5: memref<128x1xf32, #tpu.memory_space<vmem>>, %arg6: memref<128x128xbf16, #tpu.memory_space<vmem>>, %arg7: memref<1x128xf32, #tpu.memory_space<vmem>>, %arg8: memref<128x128xf32, #tpu.memory_space<vmem>>, %arg9: memref<1x128xf32, #tpu.memory_space<vmem>>, %arg10: memref<1x128xf32, #tpu.memory_space<vmem>>, %arg11: memref<128x128xf32, #tpu.memory_space<vmem>>, %arg12: memref<1x128xf32, #tpu.memory_space<vmem>>) attributes {dimension_semantics = [#tpu.dimension_semantics<arbitrary>, #tpu.dimension_semantics<arbitrary>], iteration_bounds = array<i64: 1, 1>, scalar_prefetch = 0 : i64, scratch_operands = 2 : i64, tpu.core_type = #tpu.core_type<tc>, window_params = [{transform_indices = @transform_0, window_bounds = array<i64: 128, 128>}, {transform_indices = @transform_1, window_bounds = array<i64: 128, 128>}, {transform_indices = @transform_2, window_bounds = array<i64: 128, 1>}, {transform_indices = @transform_3, window_bounds = array<i64: 128, 1>}, {pipeline_mode = #tpu.pipeline_mode<synchronous>, transform_indices = @transform_4, window_bounds = array<i64: 128, 128>}, {pipeline_mode = #tpu.pipeline_mode<synchronous>, transform_indices = @transform_5, window_bounds = array<i64: 1, 128>}, {pipeline_mode = #tpu.pipeline_mode<synchronous>, transform_indices = @transform_6, window_bounds = array<i64: 128, 128>}, {pipeline_mode = #tpu.pipeline_mode<synchronous>, transform_indices = @transform_7, window_bounds = array<i64: 1, 128>}, {pipeline_mode = #tpu.pipeline_mode<synchronous>, transform_indices = @transform_8, window_bounds = array<i64: 1, 128>}]} {
    %c0_i32 = arith.constant 0 : i32
    %0 = arith.cmpi eq, %arg1, %c0_i32 : i32
    %1 = arith.extui %0 : i1 to i32
    %c0_i32_0 = arith.constant 0 : i32
    %2 = arith.cmpi ne, %1, %c0_i32_0 : i32
    scf.if %2 {
      %cst_13 = arith.constant 0.000000e+00 : f32
      %15 = vector.broadcast %cst_13 : f32 to vector<128x128xf32>
      %c0_14 = arith.constant 0 : index
      %c0_15 = arith.constant 0 : index
      %16 = vector.load %arg11[%c0_14, %c0_15] : memref<128x128xf32, #tpu.memory_space<vmem>>, vector<128x128xf32>
      tpu.vector_store %arg11[%c0_14, %c0_15], %15 {strides = array<i32>} : memref<128x128xf32, #tpu.memory_space<vmem>>, vector<128x128xf32>,
    } else {
    }
    %c0 = arith.constant 0 : index
    %c0_1 = arith.constant 0 : index
    %3 = vector.load %arg3[%c0, %c0_1] : memref<128x128xbf16, #tpu.memory_space<vmem>>, vector<128x128xbf16>
    %c0_2 = arith.constant 0 : index
    %c0_3 = arith.constant 0 : index
    %4 = vector.load %arg6[%c0_2, %c0_3] : memref<128x128xbf16, #tpu.memory_space<vmem>>, vector<128x128xbf16>
    %cst = arith.constant dense<0.000000e+00> : vector<128x128xf32>
    %5 = tpu.matmul %3, %4, %cst {dimension_numbers = #tpu.dot_dimension_numbers<[1], [0], [0], [1], [0, 0, 1, 1], [], []>} : vector<128x128xbf16>, vector<128x128xbf16>, vector<128x128xf32> -> vector<128x128xf32>
    %c0_4 = arith.constant 0 : index
    %c0_5 = arith.constant 0 : index
    %6 = vector.load %arg11[%c0_4, %c0_5] : memref<128x128xf32, #tpu.memory_space<vmem>>, vector<128x128xf32>
    %c0_6 = arith.constant 0 : index
    %c0_7 = arith.constant 0 : index
    %7 = vector.load %arg2[%c0_6, %c0_7] : memref<128x128xbf16, #tpu.memory_space<vmem>>, vector<128x128xbf16>
    %8 = arith.truncf %5 : vector<128x128xf32> to vector<128x128xbf16>
    %cst_8 = arith.constant dense<0.000000e+00> : vector<128x128xf32>
    %9 = tpu.matmul %7, %8, %cst_8 {dimension_numbers = #tpu.dot_dimension_numbers<[1], [0], [0], [1], [0, 0, 1, 1], [], []>} : vector<128x128xbf16>, vector<128x128xbf16>, vector<128x128xf32> -> vector<128x128xf32>
    %10 = arith.addf %6, %9 : vector<128x128xf32>
    %c0_9 = arith.constant 0 : index
    %c0_10 = arith.constant 0 : index
    %11 = vector.load %arg11[%c0_9, %c0_10] : memref<128x128xf32, #tpu.memory_space<vmem>>, vector<128x128xf32>
    tpu.vector_store %arg11[%c0_9, %c0_10], %10 {strides = array<i32>} : memref<128x128xf32, #tpu.memory_space<vmem>>, vector<128x128xf32>,
    %c0_i32_11 = arith.constant 0 : i32
    %12 = arith.cmpi eq, %arg1, %c0_i32_11 : i32
    %13 = arith.extui %12 : i1 to i32
    %c0_i32_12 = arith.constant 0 : i32
    %14 = arith.cmpi ne, %13, %c0_i32_12 : i32
    scf.if %14 {
      %c0_13 = arith.constant 0 : index
      %c0_14 = arith.constant 0 : index
      %15 = vector.load %arg4[%c0_13, %c0_14] : memref<128x1xf32, #tpu.memory_space<vmem>>, vector<128x1xf32>
      %c0_15 = arith.constant 0 : index
      %c0_16 = arith.constant 0 : index
      %16 = vector.load %arg11[%c0_15, %c0_16] : memref<128x128xf32, #tpu.memory_space<vmem>>, vector<128x128xf32>
      %17 = vector.broadcast %15 : vector<128x1xf32> to vector<128x128xf32>
      %18 = arith.mulf %17, %16 : vector<128x128xf32>
      %c0_17 = arith.constant 0 : index
      %c0_18 = arith.constant 0 : index
      %19 = vector.load %arg7[%c0_17, %c0_18] : memref<1x128xf32, #tpu.memory_space<vmem>>, vector<1x128xf32>
      %20 = vector.broadcast %19 : vector<1x128xf32> to vector<128x128xf32>
      %21 = arith.addf %18, %20 : vector<128x128xf32>
      %cst_19 = arith.constant 0.000000e+00 : f32
      %22 = vector.broadcast %cst_19 : f32 to vector<128x128xf32>
      %23 = arith.maximumf %21, %22 : vector<128x128xf32>
      %c0_i32_20 = arith.constant 0 : i32
      %24 = arith.cmpi eq, %arg0, %c0_i32_20 : i32
      %25 = arith.extui %24 : i1 to i32
      %c0_i32_21 = arith.constant 0 : i32
      %26 = arith.cmpi ne, %25, %c0_i32_21 : i32
      scf.if %26 {
        %cst_31 = arith.constant 0.000000e+00 : f32
        %38 = vector.broadcast %cst_31 : f32 to vector<1x128xf32>
        %c0_32 = arith.constant 0 : index
        %c0_33 = arith.constant 0 : index
        %39 = vector.load %arg12[%c0_32, %c0_33] : memref<1x128xf32, #tpu.memory_space<vmem>>, vector<1x128xf32>
        tpu.vector_store %arg12[%c0_32, %c0_33], %38 {strides = array<i32>} : memref<1x128xf32, #tpu.memory_space<vmem>>, vector<1x128xf32>,
      } else {
      }
      %c0_22 = arith.constant 0 : index
      %c0_23 = arith.constant 0 : index
      %27 = vector.load %arg12[%c0_22, %c0_23] : memref<1x128xf32, #tpu.memory_space<vmem>>, vector<1x128xf32>
      %c0_24 = arith.constant 0 : index
      %c0_25 = arith.constant 0 : index
      %28 = vector.load %arg5[%c0_24, %c0_25] : memref<128x1xf32, #tpu.memory_space<vmem>>, vector<128x1xf32>
      %29 = vector.broadcast %28 : vector<128x1xf32> to vector<128x128xf32>
      %30 = arith.mulf %29, %23 : vector<128x128xf32>
      %cst_26 = arith.constant dense<0.000000e+00> : vector<128xf32>
      %31 = vector.multi_reduction <add>, %30, %cst_26 [0] : vector<128x128xf32> to vector<128xf32>
      %32 = vector.shape_cast %31 : vector<128xf32> to vector<1x128xf32>
      %33 = arith.addf %27, %32 : vector<1x128xf32>
      %c0_27 = arith.constant 0 : index
      %c0_28 = arith.constant 0 : index
      %34 = vector.load %arg12[%c0_27, %c0_28] : memref<1x128xf32, #tpu.memory_space<vmem>>, vector<1x128xf32>
      tpu.vector_store %arg12[%c0_27, %c0_28], %33 {strides = array<i32>} : memref<1x128xf32, #tpu.memory_space<vmem>>, vector<1x128xf32>,
      %c0_i32_29 = arith.constant 0 : i32
      %35 = arith.cmpi eq, %arg0, %c0_i32_29 : i32
      %36 = arith.extui %35 : i1 to i32
      %c0_i32_30 = arith.constant 0 : i32
      %37 = arith.cmpi ne, %36, %c0_i32_30 : i32
      scf.if %37 {
        %c0_31 = arith.constant 0 : index
        %c0_32 = arith.constant 0 : index
        %38 = vector.load %arg12[%c0_31, %c0_32] : memref<1x128xf32, #tpu.memory_space<vmem>>, vector<1x128xf32>
        %c0_33 = arith.constant 0 : index
        %c0_34 = arith.constant 0 : index
        %39 = vector.load %arg8[%c0_33, %c0_34] : memref<128x128xf32, #tpu.memory_space<vmem>>, vector<128x128xf32>
        %cst_35 = arith.constant dense<0.000000e+00> : vector<1x128xf32>
        %40 = tpu.matmul %38, %39, %cst_35 {dimension_numbers = #tpu.dot_dimension_numbers<[1], [0], [0], [1], [0, 0, 1, 1], [], []>} : vector<1x128xf32>, vector<128x128xf32>, vector<1x128xf32> -> vector<1x128xf32>
        %c0_36 = arith.constant 0 : index
        %c0_37 = arith.constant 0 : index
        %41 = vector.load %arg9[%c0_36, %c0_37] : memref<1x128xf32, #tpu.memory_space<vmem>>, vector<1x128xf32>
        %42 = arith.addf %40, %41 : vector<1x128xf32>
        %cst_38 = arith.constant 0.000000e+00 : f32
        %43 = vector.broadcast %cst_38 : f32 to vector<1x128xf32>
        %44 = arith.maximumf %42, %43 : vector<1x128xf32>
        %45 = tpu.iota {dimensions = array<i32: 1>} : vector<1x128xi32>
        %c8_i32 = arith.constant 8 : i32
        %46 = vector.broadcast %c8_i32 : i32 to vector<1x128xi32>
        %47 = arith.cmpi slt, %45, %46 : vector<1x128xi32>
        %cst_39 = arith.constant 0xFF800000 : f32
        %48 = vector.broadcast %cst_39 : f32 to vector<1x128xf32>
        %49 = arith.select %47, %44, %48 : vector<1x128xi1>, vector<1x128xf32>
        %cst_40 = arith.constant dense<0xFF800000> : vector<1xf32>
        %50 = vector.multi_reduction <maximumf>, %49, %cst_40 [1] : vector<1x128xf32> to vector<1xf32>
        %51 = vector.shape_cast %50 : vector<1xf32> to vector<1x1xf32>
        %52 = vector.broadcast %51 : vector<1x1xf32> to vector<1x128xf32>
        %53 = arith.subf %49, %52 : vector<1x128xf32>
        %54 = math.exp %53 : vector<1x128xf32>
        %cst_41 = arith.constant dense<0.000000e+00> : vector<1xf32>
        %55 = vector.multi_reduction <add>, %54, %cst_41 [1] : vector<1x128xf32> to vector<1xf32>
        %56 = vector.shape_cast %55 : vector<1xf32> to vector<1x1xf32>
        %57 = math.log %56 : vector<1x1xf32>
        %58 = vector.broadcast %51 : vector<1x1xf32> to vector<1x128xf32>
        %59 = arith.subf %49, %58 : vector<1x128xf32>
        %60 = vector.broadcast %57 : vector<1x1xf32> to vector<1x128xf32>
        %61 = arith.subf %59, %60 : vector<1x128xf32>
        %cst_42 = arith.constant 0.000000e+00 : f32
        %62 = vector.broadcast %cst_42 : f32 to vector<1x128xf32>
        %63 = arith.select %47, %61, %62 : vector<1x128xi1>, vector<1x128xf32>
        %c0_43 = arith.constant 0 : index
        %c0_44 = arith.constant 0 : index
        %64 = vector.load %arg10[%c0_43, %c0_44] : memref<1x128xf32, #tpu.memory_space<vmem>>, vector<1x128xf32>
        tpu.vector_store %arg10[%c0_43, %c0_44], %63 {strides = array<i32>} : memref<1x128xf32, #tpu.memory_space<vmem>>, vector<1x128xf32>,
      } else {
      }
    } else {
    }
    return
  }
  func.func @transform_0(%arg0: i32, %arg1: i32) -> (i32, i32) {
    %c0_i32 = arith.constant 0 : i32
    return %arg0, %arg1 : i32, i32
  }
  func.func @transform_1(%arg0: i32, %arg1: i32) -> (i32, i32) {
    %c0_i32 = arith.constant 0 : i32
    %c0_i32_0 = arith.constant 0 : i32
    return %arg1, %c0_i32 : i32, i32
  }
  func.func @transform_2(%arg0: i32, %arg1: i32) -> (i32, i32) {
    %c0_i32 = arith.constant 0 : i32
    %c0_i32_0 = arith.constant 0 : i32
    return %arg0, %c0_i32 : i32, i32
  }
  func.func @transform_3(%arg0: i32, %arg1: i32) -> (i32, i32) {
    %c0_i32 = arith.constant 0 : i32
    %c0_i32_0 = arith.constant 0 : i32
    return %arg0, %c0_i32 : i32, i32
  }
  func.func @transform_4(%arg0: i32, %arg1: i32) -> (i32, i32) {
    %c0_i32 = arith.constant 0 : i32
    %c0_i32_0 = arith.constant 0 : i32
    %c0_i32_1 = arith.constant 0 : i32
    return %c0_i32, %c0_i32_0 : i32, i32
  }
  func.func @transform_5(%arg0: i32, %arg1: i32) -> (i32, i32) {
    %c0_i32 = arith.constant 0 : i32
    %c0_i32_0 = arith.constant 0 : i32
    %c0_i32_1 = arith.constant 0 : i32
    return %c0_i32, %c0_i32_0 : i32, i32
  }
  func.func @transform_6(%arg0: i32, %arg1: i32) -> (i32, i32) {
    %c0_i32 = arith.constant 0 : i32
    %c0_i32_0 = arith.constant 0 : i32
    %c0_i32_1 = arith.constant 0 : i32
    return %c0_i32, %c0_i32_0 : i32, i32
  }
  func.func @transform_7(%arg0: i32, %arg1: i32) -> (i32, i32) {
    %c0_i32 = arith.constant 0 : i32
    %c0_i32_0 = arith.constant 0 : i32
    %c0_i32_1 = arith.constant 0 : i32
    return %c0_i32, %c0_i32_0 : i32, i32
  }
  func.func @transform_8(%arg0: i32, %arg1: i32) -> (i32, i32) {
    %c0_i32 = arith.constant 0 : i32
    %c0_i32_0 = arith.constant 0 : i32
    %c0_i32_1 = arith.constant 0 : i32
    return %c0_i32, %c0_i32_0 : i32, i32
  }
}

</mosaic_0001>

<bundles_post_ra>
// kernel: tpu_custom_call.1
= control target key start
LH: loop header
LB: loop body
LE: loop exit
PB: predicated region body
PF: predicated region fallthrough
CT: control target
= control target key end

     0   :  { %13 = vsyncpa [#allocation5], 0  ;;  %s1531_s0 = inlined_call_operand.vmem [shape: bf16[128,128], index: 0, kind: input, shape index: {}]   ;;  %s1532_s1 = inlined_call_operand.vmem [shape: bf16[128,128], index: 1, kind: input, shape index: {}]   ;;  %s1533_s2 = inlined_call_operand.vmem [shape: f32[128,1], index: 2, kind: input, shape index: {}]   ;;  %s1534_s3 = inlined_call_operand.vmem [shape: f32[128,1], index: 3, kind: input, shape index: {}]   ;;  %s1535_s4 = inlined_call_operand.hbm [shape: bf16[128,128], index: 4, kind: input, shape index: {}]   ;;  %s1536_s5 = inlined_call_operand.vmem [shape: f32[1,128], index: 5, kind: input, shape index: {}]   ;;  %s1537_s6 = inlined_call_operand.vmem [shape: f32[128,128], index: 6, kind: input, shape index: {}]   ;;  %s1538_s7 = inlined_call_operand.vmem [shape: f32[1,128], index: 7, kind: input, shape index: {}]   ;;  %s1539_s8 = inlined_call_operand.hbm [shape: f32[1,128], index: 8, kind: output, shape index: {}]  }
   0x1   :  { %14 = vsyncpa [#allocation6], 0  ;;  %s1227_s27 = smov [#allocation4]   ;;  %s1179_s9 = scalar_lea.hbm %s1535_s4, 1024 }
   0x2   :  { %s28_s28 = sshll.u32 %s1227_s27, 4  ;;  %p1180_p0 = scmp.ne.s32.totalorder %s1535_s4, %s1179_s9  ;;  %s29_s28 = int_to_ptr.vmem [resolvable:$true] %s28_s28 }
   0x3   :  { %p1183_p1 = scmp.lt.u32.totalorder %s1179_s9, %s1535_s4 }
   0x5   :  { %p1185_p2 = pnand %p1183_p1, %p1180_p0 }
   0x7   :  { %1188 = shalt.err (!%p1185_p2)
}
   0x8   :  { %s1189_s14 = scalar_lea.vmem %s29_s28, 1024  ;;  %p1194_p4 = scmp.lt.s32.totalorder %s29_s28, %s29_s28 }
   0x9   :  { %p1190_p3 = scmp.ne.s32.totalorder %s29_s28, %s1189_s14  ;;  %p1195_p5 = scmp.lt.s32.totalorder %s1189_s14, %s1189_s14 }
   0xb   :  { %p1196_p6 = por %p1195_p5, %p1194_p4 }
   0xd   :  { %p1197_p7 = pnand %p1196_p6, %p1190_p3 }
   0xf   :  { %1200 = shalt.err (!%p1197_p7)
}
  0x10   :  { %s1228_s15 = smov 64   ;;  %s1229_s16 = smov 4  }
  0x11   :  { %34 = dma.hbm_to_vmem [thread:$0]  %s1535_s4, 1024, %s29_s28, [#allocation5], %s1228_s15, %s1228_s15, %s1229_s16  }
  0x12   :  { %1223 = dma.done.wait [#allocation5], 1024  }
  0x13   :  { %1224 = vsyncadd [#allocation5], 4294966272  ;;  %v1151_v0 = vld [vmem:[#allocation4] sm:$0xff]   ;;  %v1152_v1 = vld [vmem:[#allocation4 + $0x8] sm:$0xff]   ;;  %v1230_v18 = vmov 0   ;;  %vm1233_vm0 = vmmov 0  }
  0x14   :  { %1018 = vmatprep.subr.bf16.mxu0 %v1151_v0  ;;  %v1153_v2 = vld [vmem:[#allocation4 + $0x10] sm:$0xff]   ;;  %v1154_v3 = vld [vmem:[#allocation4 + $0x18] sm:$0xff]   ;;  %v1155_v5 = vld [vmem:[#allocation4 + $0x20] sm:$0xff]   ;;  %1149 = vset.pattern.permute.xlu0 %v1230_v18  ;;  %vm914_vm2 = vcmask 1040384  }
  0x15   :  { %1019 = vmatpush3.bf16.msra.mxu0 %v1151_v0  ;;  %v1159_v4 = vld [vmem:[%s1532_s1] sm:$0xff]   ;;  %v1156_v6 = vld [vmem:[#allocation4 + $0x28] sm:$0xff]   ;;  %v1157_v7 = vld [vmem:[#allocation4 + $0x30] sm:$0xff]   ;;  %1150 = vset.pattern.permute.xlu1 %v1230_v18 }
  0x16   :  { %1020 = vmatprep.subr.bf16.mxu0 %v1152_v1  ;;  %1034 = vmatprep.mubr.bf16.mxu0 %v1159_v4  ;;  %v1158_v8 = vld [vmem:[#allocation4 + $0x38] sm:$0xff]   ;;  %v1160_v9 = vld [vmem:[%s1532_s1 + $0x8] sm:$0xff]   ;;  %v1161_v10 = vld [vmem:[%s1532_s1 + $0x10] sm:$0xff]  }
  0x17   :  { %v1162_v11 = vld [vmem:[%s1532_s1 + $0x18] sm:$0xff]   ;;  %v1163_v12 = vld [vmem:[%s1532_s1 + $0x20] sm:$0xff]   ;;  %v1164_v13 = vld [vmem:[%s1532_s1 + $0x28] sm:$0xff]  }
  0x18   :  { %v1165_v14 = vld [vmem:[%s1532_s1 + $0x30] sm:$0xff]   ;;  %v1166_v15 = vld [vmem:[%s1532_s1 + $0x38] sm:$0xff]   ;;  %v510_v16 = vld [vmem:[%s1533_s2] sm:$0xff] }
  0x19   :  { %1021 = vmatpush3.bf16.msra.mxu0 %v1152_v1  ;;  %v1167_v17 = vld [vmem:[%s1531_s0] sm:$0xff]   ;;  %544 = vperm.xlu0 %1149, %v510_v16   ;;  %v512_v19 = vld [vmem:[%s1533_s2 + $0x10] sm:$0xff]  ;;  %v511_v20 = vld [vmem:[%s1533_s2 + $0x8] sm:$0xff] }
  0x1a   :  { %1022 = vmatprep.subr.bf16.mxu0 %v1153_v2  ;;  %1066 = vmatprep.mubr.bf16.mxu1 %v1167_v17  ;;  %v513_v21 = vld [vmem:[%s1533_s2 + $0x18] sm:$0xff]  ;;  %v514_v22 = vld [vmem:[%s1533_s2 + $0x20] sm:$0xff]  ;;  %v684_v24 = vld [vmem:[%s1534_s3 + $0x8] sm:$0xff] }
  0x1b   :  { %554 = vperm.xlu1 %1150, %v512_v19   ;;  %v683_v23 = vld [vmem:[%s1534_s3] sm:$0xff]  ;;  %v515_v25 = vld [vmem:[%s1533_s2 + $0x28] sm:$0xff]  ;;  %v685_v26 = vld [vmem:[%s1534_s3 + $0x10] sm:$0xff] }
  0x1c   :  { %v516_v27 = vld [vmem:[%s1533_s2 + $0x30] sm:$0xff]  ;;  %v686_v28 = vld [vmem:[%s1534_s3 + $0x18] sm:$0xff]  ;;  %v687_v30 = vld [vmem:[%s1534_s3 + $0x20] sm:$0xff] }
  0x1d   :  { %1023 = vmatpush3.bf16.msra.mxu0 %v1153_v2  ;;  %549 = vperm.xlu0 %1149, %v511_v20   ;;  %v517_v29 = vld [vmem:[%s1533_s2 + $0x38] sm:$0xff]  ;;  %v518_v31 = vld [vmem:[%s1533_s2 + $0x40] sm:$0xff]  ;;  %v688_v32 = vld [vmem:[%s1534_s3 + $0x28] sm:$0xff]  ;;  %v1231_v20 = vmov 0.0|0.0  }
  0x1e   :  { %1024 = vmatprep.subr.bf16.mxu0 %v1154_v3  ;;  %v519_v33 = vld [vmem:[%s1533_s2 + $0x48] sm:$0xff]  ;;  %v689_v34 = vld [vmem:[%s1534_s3 + $0x30] sm:$0xff]  ;;  %v690_v36 = vld [vmem:[%s1534_s3 + $0x38] sm:$0xff] }
  0x1f   :  { %559 = vperm.xlu1 %1150, %v513_v21   ;;  %v520_v35 = vld [vmem:[%s1533_s2 + $0x50] sm:$0xff]  ;;  %v521_v37 = vld [vmem:[%s1533_s2 + $0x58] sm:$0xff]  ;;  %v691_v38 = vld [vmem:[%s1534_s3 + $0x40] sm:$0xff] }
  0x20   :  { %v522_v39 = vld [vmem:[%s1533_s2 + $0x60] sm:$0xff]  ;;  %v692_v40 = vld [vmem:[%s1534_s3 + $0x48] sm:$0xff]  ;;  %v693_v42 = vld [vmem:[%s1534_s3 + $0x50] sm:$0xff] }
  0x21   :  { %1025 = vmatpush3.bf16.msra.mxu0 %v1154_v3  ;;  %564 = vperm.xlu0 %1149, %v514_v22   ;;  %v523_v41 = vld [vmem:[%s1533_s2 + $0x68] sm:$0xff]  ;;  %v524_v43 = vld [vmem:[%s1533_s2 + $0x70] sm:$0xff]  ;;  %v694_v44 = vld [vmem:[%s1534_s3 + $0x58] sm:$0xff] }
  0x22   :  { %1026 = vmatprep.subr.bf16.mxu0 %v1155_v5  ;;  %v525_v45 = vld [vmem:[%s1533_s2 + $0x78] sm:$0xff]  ;;  %v695_v46 = vld [vmem:[%s1534_s3 + $0x60] sm:$0xff]  ;;  %v696_v47 = vld [vmem:[%s1534_s3 + $0x68] sm:$0xff] }
  0x23   :  { %701 = vperm.xlu1 %1150, %v683_v23   ;;  %v697_v48 = vld [vmem:[%s1534_s3 + $0x70] sm:$0xff]  ;;  %v698_v49 = vld [vmem:[%s1534_s3 + $0x78] sm:$0xff]  ;;  %v822_v17 = vld [vmem:[%s1537_s6] sm:$0xff] }
  0x24   :  { %v1174_v16 = vld [vmem:[%s1531_s0 + $0x38] sm:$0xff]   ;;  %v823_v18 = vld [vmem:[%s1537_s6 + $0x8] sm:$0xff]  ;;  %v824_v21 = vld [vmem:[%s1537_s6 + $0x10] sm:$0xff] }
  0x25   :  { %1027 = vmatpush3.bf16.msra.mxu0 %v1155_v5  ;;  %706 = vperm.xlu0 %1149, %v684_v24   ;;  %v1118_v19 = vpack.c.bf16 %v823_v18, %v822_v17  ;;  %v825_v22 = vld [vmem:[%s1537_s6 + $0x18] sm:$0xff]  ;;  %v826_v24 = vld [vmem:[%s1537_s6 + $0x20] sm:$0xff] }
  0x26   :  { %1028 = vmatprep.subr.bf16.mxu0 %v1156_v6  ;;  %v1121_v23 = vpack.c.bf16 %v825_v22, %v824_v21 }
  0x27   :  { %569 = vperm.xlu1 %1150, %v515_v25   ;;  %v827_v25 = vld [vmem:[%s1537_s6 + $0x28] sm:$0xff] }
  0x29   :  { %1029 = vmatpush3.bf16.msra.mxu0 %v1156_v6  ;;  %711 = vperm.xlu0 %1149, %v685_v26   ;;  %v1124_v26 = vpack.c.bf16 %v827_v25, %v826_v24 }
  0x2a   :  { %1030 = vmatprep.subr.bf16.mxu0 %v1157_v7 }
  0x2b   :  { %574 = vperm.xlu1 %1150, %v516_v27   ;;  %v828_v27 = vld [vmem:[%s1537_s6 + $0x30] sm:$0xff] }
  0x2d   :  { %1031 = vmatpush3.bf16.msra.mxu0 %v1157_v7  ;;  %716 = vperm.xlu0 %1149, %v686_v28   ;;  %v829_v28 = vld [vmem:[%s1537_s6 + $0x38] sm:$0xff] }
  0x2e   :  { %1032 = vmatprep.subr.bf16.mxu0 %v1158_v8 }
  0x2f   :  { %579 = vperm.xlu1 %1150, %v517_v29   ;;  %v1127_v29 = vpack.c.bf16 %v829_v28, %v828_v27 }
  0x31   :  { %1033 = vmatpush3.bf16.msra.mxu0 %v1158_v8  ;;  %721 = vperm.xlu0 %1149, %v687_v30   ;;  %v830_v30 = vld [vmem:[%s1537_s6 + $0x40] sm:$0xff] }
  0x32   :  { %1117 = vmatprep.subr.bf16.mxu0 %v1231_v20 }
  0x33   :  { %584 = vperm.xlu1 %1150, %v518_v31   ;;  %v831_v31 = vld [vmem:[%s1537_s6 + $0x48] sm:$0xff] }
  0x34   :  { %1035 = vmatmul.mubr.bf16.vlgmr.msra.gmra.mrb[0].mxu0 %v1160_v9 }
  0x35   :  { %1038 = vmatprep.mubr.bf16.mxu0 %v1161_v10  ;;  %726 = vperm.xlu0 %1149, %v688_v32   ;;  %v1168_v10 = vld [vmem:[%s1531_s0 + $0x8] sm:$0xff]   ;;  %v1232_v32 = vmov 0.0  }
  0x36   :  { %1119 = vmatpush3.bf16.msra.mxu0 %v1118_v19  ;;  %681 = vst [vmem:[#allocation3] sm:$0x1] %v1232_v32 }
  0x37   :  { %589 = vperm.xlu1 %1150, %v519_v33   ;;  %1120 = vmatprep.subr.bf16.mxu0 %v1231_v20  ;;  %v1130_v33 = vpack.c.bf16 %v831_v31, %v830_v30 }
  0x39   :  { %731 = vperm.xlu0 %1149, %v689_v34   ;;  %v832_v34 = vld [vmem:[%s1537_s6 + $0x50] sm:$0xff] }
  0x3a   :  { %1122 = vmatpush3.bf16.msra.mxu0 %v1121_v23 }
  0x3b   :  { %594 = vperm.xlu1 %1150, %v520_v35   ;;  %1123 = vmatprep.subr.bf16.mxu0 %v1231_v20  ;;  %v833_v35 = vld [vmem:[%s1537_s6 + $0x58] sm:$0xff] }
  0x3c   :  { %1039 = vmatmul.mubr.bf16.gmra.mrb[4].mxu0 %v1162_v11  ;;  %v1169_v11 = vld [vmem:[%s1531_s0 + $0x10] sm:$0xff]  }
  0x3d   :  { %1042 = vmatprep.mubr.bf16.mxu0 %v1163_v12  ;;  %736 = vperm.xlu0 %1149, %v690_v36   ;;  %v1170_v12 = vld [vmem:[%s1531_s0 + $0x18] sm:$0xff]   ;;  %v834_v36 = vld [vmem:[%s1537_s6 + $0x60] sm:$0xff] }
  0x3e   :  { %1125 = vmatpush3.bf16.msra.mxu0 %v1124_v26 }
  0x3f   :  { %599 = vperm.xlu1 %1150, %v521_v37   ;;  %1126 = vmatprep.subr.bf16.mxu0 %v1231_v20  ;;  %v1133_v37 = vpack.c.bf16 %v833_v35, %v832_v34 }
  0x41   :  { %741 = vperm.xlu0 %1149, %v691_v38   ;;  %v835_v38 = vld [vmem:[%s1537_s6 + $0x68] sm:$0xff] }
  0x42   :  { %1128 = vmatpush3.bf16.msra.mxu0 %v1127_v29 }
  0x43   :  { %604 = vperm.xlu1 %1150, %v522_v39   ;;  %1129 = vmatprep.subr.bf16.mxu0 %v1231_v20  ;;  %v1136_v39 = vpack.c.bf16 %v835_v38, %v834_v36 }
  0x44   :  { %1043 = vmatmul.mubr.bf16.gmra.mrb[8].mxu0 %v1164_v13  ;;  %v1171_v13 = vld [vmem:[%s1531_s0 + $0x20] sm:$0xff]  }
  0x45   :  { %1046 = vmatprep.mubr.bf16.mxu0 %v1165_v14  ;;  %746 = vperm.xlu0 %1149, %v692_v40   ;;  %v1172_v14 = vld [vmem:[%s1531_s0 + $0x28] sm:$0xff]   ;;  %v836_v40 = vld [vmem:[%s1537_s6 + $0x70] sm:$0xff] }
  0x46   :  { %1131 = vmatpush3.bf16.msra.mxu0 %v1130_v33 }
  0x47   :  { %609 = vperm.xlu1 %1150, %v523_v41   ;;  %1132 = vmatprep.subr.bf16.mxu0 %v1231_v20  ;;  %v837_v41 = vld [vmem:[%s1537_s6 + $0x78] sm:$0xff] }
  0x49   :  { %751 = vperm.xlu0 %1149, %v693_v42   ;;  %v1139_v42 = vpack.c.bf16 %v837_v41, %v836_v40 }
  0x4a   :  { %1134 = vmatpush3.bf16.msra.mxu0 %v1133_v37 }
  0x4b   :  { %614 = vperm.xlu1 %1150, %v524_v43   ;;  %1135 = vmatprep.subr.bf16.mxu0 %v1231_v20 }
  0x4c   :  { %1047 = vmatmul.mubr.bf16.gmra.mrb[12].mxu0 %v1166_v15  ;;  %v1173_v15 = vld [vmem:[%s1531_s0 + $0x30] sm:$0xff]  }
  0x4d   :  { %756 = vperm.xlu0 %1149, %v694_v44   ;;  %1114 = vmatprep.mubr.msk.f32.mxu0 %vm1233_vm0, %v1232_v32 }
  0x4e   :  { %1137 = vmatpush3.bf16.msra.mxu0 %v1136_v39 }
  0x4f   :  { %619 = vperm.xlu1 %1150, %v525_v45   ;;  %1138 = vmatprep.subr.bf16.mxu0 %v1231_v20 }
  0x51   :  { %761 = vperm.xlu0 %1149, %v695_v46  }
  0x52   :  { %1140 = vmatpush3.bf16.msra.mxu0 %v1139_v42 }
  0x53   :  { %766 = vperm.xlu1 %1150, %v696_v47  }
  0x55   :  { %771 = vperm.xlu0 %1149, %v697_v48  }
  0x57   :  { %776 = vperm.xlu1 %1150, %v698_v49  }
  0x98   :  { %v545_v43 = vpop.permute.xlu0 %544 }
  0x9a   :  { %v555_v44 = vpop.permute.xlu1 %554 }
  0x9c   :  { %v550_v45 = vpop.permute.xlu0 %549 }
  0x9e   :  { %v560_v46 = vpop.permute.xlu1 %559 }
  0xa0   :  { %v565_v47 = vpop.permute.xlu0 %564 }
  0xa2   :  { %v702_v48 = vpop.permute.xlu1 %701 }
  0xa4   :  { %v707_v49 = vpop.permute.xlu0 %706 }
 0x107   :  { %v1036_v50 = vpop.f32.mrb[0].mxu0 }
 0x108   :  { %v227_v51 = vpop.f32.mrb[1].mxu0 }
 0x109   :  { %v1037_v52 = vpop.f32.mrb[2].mxu0 }
 0x10a   :  { %v323_v53 = vpack.c.bf16 %v1037_v52, %v1036_v50  ;;  %v230_v54 = vpop.f32.mrb[3].mxu0  ;;  %v570_v50 = vpop.permute.xlu1 %569 }
 0x10b   :  { %v322_v55 = vpack.c.bf16 %v230_v54, %v227_v51  ;;  %v712_v51 = vpop.permute.xlu0 %711 }
 0x10d   :  { %1050 = vmatprep.subr.bf16.mxu1 %v322_v55 }
 0x10e   :  { %1051 = vmatpush3.bf16.msra.mxu1 %v322_v55  ;;  %v575_v52 = vpop.permute.xlu1 %574 }
 0x10f   :  { %v1040_v56 = vpop.f32.mrb[4].mxu0  ;;  %1052 = vmatprep.subr.bf16.mxu1 %v323_v53 }
 0x110   :  { %v243_v57 = vpop.f32.mrb[5].mxu0 }
 0x111   :  { %v1041_v58 = vpop.f32.mrb[6].mxu0 }
 0x112   :  { %v325_v59 = vpack.c.bf16 %v1041_v58, %v1040_v56  ;;  %v246_v60 = vpop.f32.mrb[7].mxu0  ;;  %1053 = vmatpush3.bf16.msra.mxu1 %v323_v53  ;;  %v717_v53 = vpop.permute.xlu0 %716 }
 0x113   :  { %v324_v61 = vpack.c.bf16 %v246_v60, %v243_v57  ;;  %v580_v54 = vpop.permute.xlu1 %579 }
 0x115   :  { %1054 = vmatprep.subr.bf16.mxu1 %v324_v61 }
 0x116   :  { %1055 = vmatpush3.bf16.msra.mxu1 %v324_v61  ;;  %v722_v55 = vpop.permute.xlu0 %721 }
 0x117   :  { %v1044_v62 = vpop.f32.mrb[8].mxu0  ;;  %1056 = vmatprep.subr.bf16.mxu1 %v325_v59  ;;  %v585_v56 = vpop.permute.xlu1 %584 }
 0x118   :  { %v259_v63 = vpop.f32.mrb[9].mxu0 }
 0x119   :  { %v1045_v0 = vpop.f32.mrb[10].mxu0 }
 0x11a   :  { %v327_v1 = vpack.c.bf16 %v1045_v0, %v1044_v62  ;;  %v262_v2 = vpop.f32.mrb[11].mxu0  ;;  %1057 = vmatpush3.bf16.msra.mxu1 %v325_v59  ;;  %v727_v57 = vpop.permute.xlu0 %726 }
 0x11b   :  { %v326_v3 = vpack.c.bf16 %v262_v2, %v259_v63  ;;  %v1484_v58 = vpop.permute.xlu1 %589  ;;  %v1491_v63 = vld [vmem:[%s1536_s5] ss:$0 sm:$0xff] }
 0x11d   :  { %1058 = vmatprep.subr.bf16.mxu1 %v326_v3 }
 0x11e   :  { %1059 = vmatpush3.bf16.msra.mxu1 %v326_v3  ;;  %v732_v59 = vpop.permute.xlu0 %731 }
 0x11f   :  { %v1048_v4 = vpop.f32.mrb[12].mxu0  ;;  %1060 = vmatprep.subr.bf16.mxu1 %v327_v1  ;;  %v595_v60 = vpop.permute.xlu1 %594 }
 0x120   :  { %v275_v5 = vpop.f32.mrb[13].mxu0 }
 0x121   :  { %v1049_v6 = vpop.f32.mrb[14].mxu0 }
 0x122   :  { %v329_v7 = vpack.c.bf16 %v1049_v6, %v1048_v4  ;;  %v278_v8 = vpop.f32.mrb[15].mxu0  ;;  %1061 = vmatpush3.bf16.msra.mxu1 %v327_v1  ;;  %v1486_v61 = vpop.permute.xlu0 %736 }
 0x123   :  { %v328_v9 = vpack.c.bf16 %v278_v8, %v275_v5  ;;  %v600_v0 = vpop.permute.xlu1 %599 }
 0x125   :  { %1062 = vmatprep.subr.bf16.mxu1 %v328_v9 }
 0x126   :  { %1063 = vmatpush3.bf16.msra.mxu1 %v328_v9 }
 0x127   :  { %1064 = vmatprep.subr.bf16.mxu1 %v329_v7 }
 0x12a   :  { %1065 = vmatpush3.bf16.msra.mxu1 %v329_v7 }
 0x12d   :  { %1067 = vmatmul.mubr.bf16.vlgmr.msra.gmra.mrb[0].mxu1 %v1168_v10  ;;  %v742_v10 = vpop.permute.xlu0 %741 }
 0x12e   :  { %1070 = vmatprep.mubr.bf16.mxu1 %v1169_v11 }
 0x131   :  { %v747_v25 = vpop.permute.xlu0 %746 }
 0x135   :  { %1071 = vmatmul.mubr.bf16.gmra.mrb[4].mxu1 %v1170_v12 }
 0x136   :  { %1074 = vmatprep.mubr.bf16.mxu1 %v1171_v13 }
 0x13d   :  { %1075 = vmatmul.mubr.bf16.gmra.mrb[8].mxu1 %v1172_v14  ;;  %v1497_v14 = vpop.permute.xlu1 %604 }
 0x13e   :  { %1078 = vmatprep.mubr.bf16.mxu1 %v1173_v15 }
 0x141   :  { %v610_v33 = vpop.permute.xlu1 %609 }
 0x145   :  { %1079 = vmatmul.mubr.bf16.gmra.mrb[12].mxu1 %v1174_v16 }
 0x200   :  { %v1068_v62 = vpop.f32.mrb[0].mxu1 }
 0x201   :  { %v624_v1 = vmul.f32 %v1068_v62, %v555_v44  ;;  %v412_v2 = vpop.f32.mrb[1].mxu1  ;;  %v752_v44 = vpop.permute.xlu0 %751 }
 0x202   :  { %v622_v3 = vmul.f32 %v545_v43, %v412_v2  ;;  %v1069_v4 = vpop.f32.mrb[2].mxu1 }
 0x203   :  { %v647_v5 = vadd.f32 %v1491_v63, %v624_v1  ;;  %v625_v6 = vmul.f32 %v1069_v4, %v560_v46  ;;  %v415_v7 = vpop.f32.mrb[3].mxu1 }
 0x204   :  { %v645_v8 = vadd.f32 %v1491_v63, %v622_v3  ;;  %v623_v9 = vmul.f32 %v550_v45, %v415_v7 }
 0x205   :  { %v648_v11 = vadd.f32 %v1491_v63, %v625_v6  ;;  %v663_v15 = vmax.f32 %v647_v5, 0.0 }
 0x206   :  { %v661_v12 = vmax.f32 %v645_v8, 0.0  ;;  %v646_v13 = vadd.f32 %v1491_v63, %v623_v9 }
 0x207   :  { %v664_v18 = vmax.f32 %v648_v11, 0.0  ;;  %v781_v26 = vmul.f32 %v712_v51, %v663_v15 }
 0x208   :  { %v662_v16 = vmax.f32 %v646_v13, 0.0  ;;  %v1072_v17 = vpop.f32.mrb[4].mxu1  ;;  %v779_v21 = vmul.f32 %v702_v48, %v661_v12 }
 0x209   :  { %v628_v19 = vmul.f32 %v1072_v17, %v575_v52  ;;  %v428_v20 = vpop.f32.mrb[5].mxu1  ;;  %v782_v34 = vmul.f32 %v717_v53, %v664_v18  ;;  %v615_v52 = vpop.permute.xlu1 %614 }
 0x20a   :  { %v780_v22 = vmul.f32 %v707_v49, %v662_v16  ;;  %v626_v23 = vmul.f32 %v565_v47, %v428_v20  ;;  %v1073_v24 = vpop.f32.mrb[6].mxu1 }
 0x20b   :  { %v629_v27 = vmul.f32 %v1073_v24, %v580_v54  ;;  %v431_v28 = vpop.f32.mrb[7].mxu1  ;;  %v651_v30 = vadd.f32 %v1491_v63, %v628_v19 }
 0x20c   :  { %v795_v29 = vadd.f32 %v780_v22, %v779_v21  ;;  %v649_v31 = vadd.f32 %v1491_v63, %v626_v23  ;;  %v627_v32 = vmul.f32 %v570_v50, %v431_v28 }
 0x20d   :  { %v652_v37 = vadd.f32 %v1491_v63, %v629_v27  ;;  %v667_v39 = vmax.f32 %v651_v30, 0.0 }
 0x20e   :  { %v796_v35 = vadd.f32 %v795_v29, %v781_v26  ;;  %v665_v36 = vmax.f32 %v649_v31, 0.0  ;;  %v650_v38 = vadd.f32 %v1491_v63, %v627_v32 }
 0x20f   :  { %v668_v48 = vmax.f32 %v652_v37, 0.0  ;;  %v785_v1 = vmul.f32 %v732_v59, %v667_v39  ;;  %v620_v59 = vpop.permute.xlu1 %619 }
 0x210   :  { %v783_v40 = vmul.f32 %v722_v55, %v665_v36  ;;  %v797_v41 = vadd.f32 %v796_v35, %v782_v34  ;;  %v666_v42 = vmax.f32 %v650_v38, 0.0  ;;  %v1076_v43 = vpop.f32.mrb[8].mxu1 }
 0x211   :  { %v632_v45 = vmul.f32 %v1076_v43, %v595_v60  ;;  %v444_v46 = vpop.f32.mrb[9].mxu1  ;;  %v786_v60 = vmul.f32 %v1486_v61, %v668_v48  ;;  %v682_v48 = vld [vmem:[#allocation3] sm:$0x1] }
 0x212   :  { %v798_v47 = vadd.f32 %v797_v41, %v783_v40  ;;  %v784_v49 = vmul.f32 %v727_v57, %v666_v42  ;;  %v630_v50 = vmul.f32 %v585_v56, %v444_v46  ;;  %v1077_v51 = vpop.f32.mrb[10].mxu1  ;;  %v757_v57 = vpop.permute.xlu0 %756 }
 0x213   :  { %v655_v53 = vadd.f32 %v1491_v63, %v632_v45  ;;  %v633_v54 = vmul.f32 %v1077_v51, %v600_v0  ;;  %v447_v62 = vpop.f32.mrb[11].mxu1  ;;  %v767_v30 = vpop.permute.xlu1 %766 }
 0x214   :  { %v799_v2 = vadd.f32 %v798_v47, %v784_v49  ;;  %v653_v55 = vadd.f32 %v1491_v63, %v630_v50  ;;  %v631_v3 = vmul.f32 %v1484_v58, %v447_v62 }
 0x215   :  { %v656_v4 = vadd.f32 %v1491_v63, %v633_v54  ;;  %v671_v7 = vmax.f32 %v655_v53, 0.0  ;;  %v838_v53 = vld [vmem:[%s1538_s7] sm:$0x1]  ;;  %s1234_s7 = smov [#allocation7]  }
 0x216   :  { %v800_v5 = vadd.f32 %v799_v2, %v785_v1  ;;  %v669_v6 = vmax.f32 %v653_v55, 0.0  ;;  %v654_v56 = vadd.f32 %v1491_v63, %v631_v3  ;;  %v762_v24 = vpop.permute.xlu0 %761  ;;  %s935_s0 = sshll.u32 %s1234_s7, 4  ;;  %s936_s0 = int_to_ptr.vmem [resolvable:$true] %s935_s0 }
 0x217   :  { %v672_v12 = vmax.f32 %v656_v4, 0.0  ;;  %v789_v61 = vmul.f32 %v752_v44, %v671_v7  ;;  %s1201_s23 = scalar_lea.vmem %s936_s0, 16  ;;  %s1205_s24 = scalar_lea.vmem %s936_s0, 32 }
 0x218   :  { %v787_v8 = vmul.f32 %v742_v10, %v669_v6  ;;  %v801_v9 = vadd.f32 %v800_v5, %v786_v60  ;;  %v670_v0 = vmax.f32 %v654_v56, 0.0  ;;  %v1080_v11 = vpop.f32.mrb[12].mxu1  ;;  %p1202_p8 = scmp.ne.s32.totalorder %s936_s0, %s1201_s23  ;;  %p1206_p9 = scmp.lt.s32.totalorder %s936_s0, %s936_s0 }
 0x219   :  { %v636_v13 = vmul.f32 %v1080_v11, %v615_v52  ;;  %v460_v15 = vpop.f32.mrb[13].mxu1  ;;  %v790_v26 = vmul.f32 %v757_v57, %v672_v12  ;;  %v910_v52 = vlaneseq  ;;  %p1207_p10 = scmp.lt.s32.totalorder %s1205_s24, %s1201_s23 }
 0x21a   :  { %v802_v16 = vadd.f32 %v801_v9, %v787_v8  ;;  %v788_v58 = vmul.f32 %v747_v25, %v670_v0  ;;  %v634_v17 = vmul.f32 %v1497_v14, %v460_v15  ;;  %v1081_v18 = vpop.f32.mrb[14].mxu1  ;;  %v772_v38 = vpop.permute.xlu0 %771 }
 0x21b   :  { %v637_v19 = vmul.f32 %v1081_v18, %v620_v59  ;;  %v463_v20 = vpop.f32.mrb[15].mxu1  ;;  %v659_v22 = vadd.f32 %v1491_v63, %v636_v13  ;;  %v911_v54 = vand.u32 127, %v910_v52  ;;  %p1208_p11 = por %p1207_p10, %p1206_p9 }
 0x21c   :  { %v803_v21 = vadd.f32 %v802_v16, %v788_v58  ;;  %v657_v10 = vadd.f32 %v1491_v63, %v634_v17  ;;  %v635_v23 = vmul.f32 %v610_v33, %v463_v20  ;;  %v777_v33 = vpop.permute.xlu1 %776 }
 0x21d   :  { %v660_v29 = vadd.f32 %v1491_v63, %v637_v19  ;;  %v675_v14 = vmax.f32 %v659_v22, 0.0  ;;  %vm912_vm1 = vcmp.lt.s32.totalorder %v911_v54, 8  ;;  %p1209_p12 = pnand %p1208_p11, %p1202_p8 }
 0x21e   :  { %v804_v27 = vadd.f32 %v803_v21, %v789_v61  ;;  %v673_v28 = vmax.f32 %v657_v10, 0.0  ;;  %v658_v25 = vadd.f32 %v1491_v63, %v635_v23 }
 0x21f   :  { %v676_v36 = vmax.f32 %v660_v29, 0.0  ;;  %v793_v39 = vmul.f32 %v772_v38, %v675_v14 }
 0x220   :  { %v791_v31 = vmul.f32 %v762_v24, %v673_v28  ;;  %v805_v32 = vadd.f32 %v804_v27, %v790_v26  ;;  %v674_v34 = vmax.f32 %v658_v25, 0.0 }
 0x221   :  { %v794_v41 = vmul.f32 %v777_v33, %v676_v36 }
 0x222   :  { %v806_v35 = vadd.f32 %v805_v32, %v791_v31  ;;  %v792_v37 = vmul.f32 %v767_v30, %v674_v34 }
 0x224   :  { %v807_v40 = vadd.f32 %v806_v35, %v792_v37 }
 0x226   :  { %v808_v42 = vadd.f32 %v807_v40, %v793_v39 }
 0x228   :  { %v809_v43 = vadd.f32 %v808_v42, %v794_v41 }
 0x22a   :  { %v810_v44 = vrot.slane %v809_v43, 4 }
 0x22c   :  { %v811_v45 = vadd.f32 %v810_v44, %v809_v43 }
 0x22e   :  { %v812_v46 = vrot.slane %v811_v45, 2 }
 0x230   :  { %v813_v47 = vadd.f32 %v812_v46, %v811_v45 }
 0x232   :  { %v814_v63 = vrot.slane %v813_v47, 1 }
 0x234   :  { %v815_v49 = vadd.f32 %v814_v63, %v813_v47 }
 0x236   :  { %v816_v50 = vadd.f32 %v815_v49, %v682_v48 }
 0x238   :  { %817 = vst [vmem:[#allocation3] sm:$0x1] %v816_v50 }
 0x23f   :  { %v821_v51 = vld [vmem:[#allocation3] sm:$0x1] }
 0x240   :  { %1115 = vmatmul.mubr.f32.vlgmr.msra.gmra.mrb[16].mxu0 %v821_v51 }
 0x313   :  { %v905_v62 = vpop.f32.mrb[16].mxu0 }
 0x314   :  { %v906_v1 = vadd.f32 %v905_v62, %v838_v53  ;;  %v1116_v2 = vpop.f32.mrb[17].mxu0 }
 0x316   :  { %v909_v55 = vmax.f32 %v906_v1, 0.0 }
 0x318   :  { %v913_v3 = vsel %vm912_vm1, %v909_v55, -inf }
 0x319   :  { %v915_v4 = vsel %vm914_vm2, %v913_v3, -inf }
 0x31a   :  { %916 = vmax.xlane.f32.xlu0 %v915_v4 }
 0x3a7   :  { %v917_v60 = vpop.xlane.xlu0 %916 }
 0x3a8   :  { %v918_v5 = vsub.f32 %v913_v3, %v917_v60 }
 0x3aa   :  { %v919_v6 = vmul.f32 1.442695, %v918_v5 }
 0x3ac   :  { %1175 = vpow2.f32 %v919_v6 }
 0x3b6   :  { %v1176_v56 = vpop.eup %1175 }
 0x3b7   :  { %v921_v57 = vsel %vm914_vm2, %v1176_v56, 0.0 }
 0x3b8   :  { %922 = vadd.xlane.f32.xlu1 %v921_v57 }
 0x445   :  { %v923_v7 = vpop.xlane.xlu1 %922 }
 0x446   :  { %1177 = vlog2.f32 %v923_v7 }
 0x450   :  { %v1178_v8 = vpop.eup %1177 }
 0x451   :  { %v925_v9 = vmul.f32 0.6931472, %v1178_v8 }
 0x453   :  { %v926_v0 = vsub.f32 %v918_v5, %v925_v9 }
 0x455   :  { %v927_v11 = vsel %vm912_vm1, %v926_v0, 0.0 }
 0x456   :  { %928 = vst [vmem:[#allocation7] sm:$0x1] %v927_v11 }
 0x457   :  { %1212 = shalt.err (!%p1209_p12)
}
 0x458   :  { %s1213_s27 = scalar_lea.hbm %s1539_s8, 16 }
 0x459   :  { %p1214_p13 = scmp.ne.s32.totalorder %s1539_s8, %s1213_s27  ;;  %p1217_p0 = scmp.lt.u32.totalorder %s1213_s27, %s1539_s8 }
 0x45b   :  { %p1219_p1 = pnand %p1217_p0, %p1214_p13 }
 0x45d   :  { %1222 = shalt.err (!%p1219_p1)
}
 0x45e   :  { %938 = dma.vmem_to_hbm [thread:$0]  %s936_s0, 16, %s1539_s8, [#allocation6]  }
 0x45f   :  { %1225 = dma.done.wait [#allocation6], 16  }
 0x460   :  { %1226 = vsyncadd [#allocation6], 4294967280 }
 0x461   :  { %942 = vsyncpa [#allocation5], 1 }
 0x462   :  { %943 = vsyncpa [#allocation6], 1 }

</bundles_post_ra>
